<compile_context>
chip_gen: v6e
topology: v6e:2x2x1
jax: 0.10.0
libtpu: 0.0.40
codegen_flags: <defaults>
</compile_context>

<pallas_src>
import functools
import math

import jax
import jax.numpy as jnp
from jax.experimental import pallas as pl
from jax.experimental.pallas import tpu as pltpu


def _round_up(x, m):
    return ((x + m - 1) // m) * m


def _vmem_capacity_bytes():
    """Per-core VMEM capacity; conservative (v7x) fallback if query fails."""
    try:
        return int(pltpu.get_tpu_info().vmem_capacity_bytes)
    except Exception:
        return 64 * 1024 * 1024


def _choose_tile_and_vmem(n_rows, feat_dims, hidden_dim, itemsize, tile_cap=8192):
    """Pick the row-tile size and a matching vmem_limit_bytes.

    Row-tiled blocks are lane-padded to 128 in VMEM, so a (tile, 24) f32 block
    still costs tile*512 B.  We budget ~1/3 of VMEM for the double-buffered
    row blocks (inputs + output); weights/bias are resident and tiny.
    """
    capacity = _vmem_capacity_bytes()
    per_row = sum(_round_up(d, 128) for d in feat_dims) * itemsize   # feats
    per_row += _round_up(hidden_dim, 128) * itemsize                 # h
    per_row += _round_up(hidden_dim, 128) * itemsize                 # out
    budget = capacity // 3
    tile = budget // (2 * per_row)                                   # double-buffered
    tile = max(8, (min(tile, tile_cap) // 8) * 8)
    tile = min(tile, _round_up(n_rows, 8))
    need = 2 * per_row * tile + (8 << 20)                            # + residents/headroom
    vmem_limit = int(max(32 << 20, need))
    return int(tile), vmem_limit


def _gru_fused_kernel(*refs, hidden_dim):
    """refs = (feat_0, [feat_1,] h, w_feat_0, [w_feat_1,] w_h, bias, out).

    Fused weight column layout (4H wide):
        [0:H]   -> i_r + h_r   (+ b_ih_r + b_hh_r)
        [H:2H]  -> i_z + h_z   (+ b_ih_z + b_hh_z)
        [2H:3H] -> i_n         (+ b_ih_n)
        [3H:4H] -> h_n         (+ b_hh_n)
    """
    n_feat = (len(refs) - 4) // 2
    feat_refs = refs[:n_feat]
    h_ref = refs[n_feat]
    w_feat_refs = refs[n_feat + 1:2 * n_feat + 1]
    wh_ref = refs[2 * n_feat + 1]
    b_ref = refs[2 * n_feat + 2]
    out_ref = refs[2 * n_feat + 3]
    H = hidden_dim

    h = h_ref[...]  # native dtype; MXU operand

    # One fused (TILE_N, 4H) gate slab, f32 accumulation on the MXU.
    g = jnp.dot(h, wh_ref[...], preferred_element_type=jnp.float32)
    for f_ref, w_ref in zip(feat_refs, w_feat_refs):
        g = g + jnp.dot(f_ref[...], w_ref[...], preferred_element_type=jnp.float32)
    g = g + b_ref[...].astype(jnp.float32)

    # torch.nn.GRUCell gate math; r and z sigmoids merged into one EUP call.
    rz = jax.nn.sigmoid(g[:, 0:2 * H])
    r = rz[:, 0:H]
    z = rz[:, H:2 * H]
    n = jnp.tanh(g[:, 2 * H:3 * H] + r * g[:, 3 * H:4 * H])
    h_new = (1.0 - z) * n + z * h.astype(jnp.float32)

    out_ref[...] = h_new.astype(out_ref.dtype)


def _gru_cell_pallas(feats, h, w_feats, w_h, bias, hidden_dim):
    """feats: list of (N, d_i) arrays; h: (N, H). Returns (N, H)."""
    N = h.shape[0]
    H = hidden_dim
    itemsize = jnp.dtype(h.dtype).itemsize
    feat_dims = [f.shape[1] for f in feats]
    tile_n, vmem_limit = _choose_tile_and_vmem(N, feat_dims, H, itemsize)
    grid = (pl.cdiv(N, tile_n),)

    def row_spec(d):
        return pl.BlockSpec((tile_n, d), lambda i: (i, 0))

    def resident_spec(arr):
        # Full-array block with a constant index_map: fetched once, stays in VMEM.
        return pl.BlockSpec(arr.shape, lambda i: (0, 0))

    in_specs = ([row_spec(d) for d in feat_dims]
                + [row_spec(H)]
                + [resident_spec(w) for w in w_feats]
                + [resident_spec(w_h), resident_spec(bias)])

    in_dim = sum(feat_dims)
    K = in_dim + H
    cost = pl.CostEstimate(
        flops=int(2 * N * K * 4 * H + 10 * N * H),
        transcendentals=int(3 * N * H),
        bytes_accessed=int(itemsize * N * (in_dim + 2 * H) + 4 * (K + 1) * 4 * H),
    )

    kernel = functools.partial(_gru_fused_kernel, hidden_dim=H)
    return pl.pallas_call(
        kernel,
        out_shape=jax.ShapeDtypeStruct((N, H), h.dtype),
        grid=grid,
        in_specs=in_specs,
        out_specs=pl.BlockSpec((tile_n, H), lambda i: (i, 0)),
        compiler_params=pltpu.CompilerParams(
            dimension_semantics=("parallel",),
            vmem_limit_bytes=vmem_limit,
        ),
        cost_estimate=cost,
    )(*feats, h, *w_feats, w_h, bias)


class GRUVertexUpdatePallas:
    """JAX/Pallas port of GRUVertexUpdate (nn.GRUCell on concat([m_v, x_v]))."""

    def __init__(self, hidden_dim, message_dim, vertex_state_dim, key):
        self.hidden_dim = hidden_dim
        self.message_dim = message_dim
        self.vertex_state_dim = vertex_state_dim
        input_dim = message_dim + vertex_state_dim
        H = hidden_dim

        # torch.nn.GRUCell init: U(-1/sqrt(H), 1/sqrt(H)) for all params.
        k = 1.0 / math.sqrt(hidden_dim)
        k1, k2, k3, k4 = jax.random.split(key, 4)
        # Stored pre-transposed: (in_dim, 3H), (H, 3H); gate order (r, z, n).
        self.w_ih_t = jax.random.uniform(k1, (input_dim, 3 * H), jnp.float32, -k, k)
        self.w_hh_t = jax.random.uniform(k2, (H, 3 * H), jnp.float32, -k, k)
        self.b_ih = jax.random.uniform(k3, (3 * H,), jnp.float32, -k, k)
        self.b_hh = jax.random.uniform(k4, (3 * H,), jnp.float32, -k, k)

        # ---- fused layout (built once at init, zero runtime cost) ----------
        # input-weight block: columns [r | z | i_n | 0]
        w_in_fused = jnp.concatenate(
            [self.w_ih_t, jnp.zeros((input_dim, H), jnp.float32)], axis=1)
        # hidden-weight block: columns [r | z | 0 | h_n]
        w_h_fused = jnp.concatenate(
            [self.w_hh_t[:, 0:2 * H],
             jnp.zeros((H, H), jnp.float32),
             self.w_hh_t[:, 2 * H:3 * H]], axis=1)
        # bias: [b_r_ih+b_r_hh | b_z_ih+b_z_hh | b_in | b_hn]
        b_fused = jnp.concatenate(
            [self.b_ih[0:H] + self.b_hh[0:H],
             self.b_ih[H:2 * H] + self.b_hh[H:2 * H],
             self.b_ih[2 * H:3 * H],
             self.b_hh[2 * H:3 * H]]).reshape(1, 4 * H)

        # Row-split the input-weight block so m_v / x_v are separate kernel
        # inputs (no wrapper-side concat of the activations).
        self.w_m = w_in_fused[:message_dim]
        self.w_x = w_in_fused[message_dim:] if vertex_state_dim > 0 else None
        self.w_h_fused = w_h_fused
        self.b_fused = b_fused

    def __call__(self, m_v, h_v, x_v=None):
        if self.vertex_state_dim > 0:
            return self._forward_with_vertex_state(m_v, h_v, x_v)
        return self._forward_without_vertex_state(m_v, h_v)

    def _run(self, feats, h2):
        w_feats = [self.w_m] + ([self.w_x] if (self.w_x is not None and len(feats) > 1) else [])
        return _gru_cell_pallas(feats, h2, w_feats, self.w_h_fused,
                                self.b_fused, self.hidden_dim)

    def _forward_with_vertex_state(self, m_v, h_v, x_v):
        if h_v.ndim == 3:
            batch_size, order, hidden_dim = h_v.shape
            h2 = h_v.reshape(-1, hidden_dim)
            m2 = m_v.reshape(-1, m_v.shape[-1])
            out = self._run([m2, x_v], h2)
            return out.reshape(batch_size, order, hidden_dim)
        return self._run([m_v, x_v], h_v)

    def _forward_without_vertex_state(self, m_v, h_v):
        if h_v.ndim == 3:
            batch_size, order, hidden_dim = h_v.shape
            h2 = h_v.reshape(-1, hidden_dim)
            m2 = m_v.reshape(-1, m_v.shape[-1])
            out = self._run([m2], h2)
            return out.reshape(batch_size, order, hidden_dim)
        return self._run([m_v], h_v)


def _gru_cell_ref(x, h, w_ih_t, w_hh_t, b_ih, b_hh, H):
    """Pure-JAX torch.nn.GRUCell semantics (unfused), for verification."""
    gi = x @ w_ih_t + b_ih
    gh = h @ w_hh_t + b_hh
    r = jax.nn.sigmoid(gi[:, :H] + gh[:, :H])
    z = jax.nn.sigmoid(gi[:, H:2 * H] + gh[:, H:2 * H])
    n = jnp.tanh(gi[:, 2 * H:] + r * gh[:, 2 * H:])
    return (1.0 - z) * n + z * h


if __name__ == "__main__":
    hidden_dim = 32
    message_dim = 24
    vertex_state_dim = 8
    batch, order = 2, 4
    N = batch * order

    key = jax.random.PRNGKey(0)
    kp, km, kh, kx, kp2 = jax.random.split(key, 5)

    m_v = jax.random.normal(km, (batch, order, message_dim), jnp.float32)
    h_v = jax.random.normal(kh, (batch, order, hidden_dim), jnp.float32)
    x_v = jax.random.normal(kx, (N, vertex_state_dim), jnp.float32)

    # --- path 1: with vertex state (concat([m_v, x_v]) input), 3-D h_v ------
    module = GRUVertexUpdatePallas(hidden_dim, message_dim, vertex_state_dim, kp)
    out = jax.block_until_ready(module(m_v, h_v, x_v))
    assert out.shape == (batch, order, hidden_dim)

    inp_ref = jnp.concatenate([m_v.reshape(-1, message_dim), x_v], axis=1)
    ref = _gru_cell_ref(inp_ref, h_v.reshape(-1, hidden_dim),
                        module.w_ih_t, module.w_hh_t, module.b_ih, module.b_hh,
                        hidden_dim).reshape(batch, order, hidden_dim)
    assert jnp.allclose(out, ref, atol=1e-5, rtol=1e-5), "vertex-state path mismatch"

    # --- path 2: without vertex state, 3-D h_v -------------------------------
    module2 = GRUVertexUpdatePallas(hidden_dim, message_dim, 0, kp2)
    out2 = jax.block_until_ready(module2(m_v, h_v))
    assert out2.shape == (batch, order, hidden_dim)
    ref2 = _gru_cell_ref(m_v.reshape(-1, message_dim), h_v.reshape(-1, hidden_dim),
                         module2.w_ih_t, module2.w_hh_t, module2.b_ih, module2.b_hh,
                         hidden_dim).reshape(batch, order, hidden_dim)
    assert jnp.allclose(out2, ref2, atol=1e-5, rtol=1e-5), "no-vertex-state path mismatch"

    # --- path 3: with vertex state, 2-D h_v (already flattened) --------------
    out3 = jax.block_until_ready(
        module(m_v.reshape(-1, message_dim), h_v.reshape(-1, hidden_dim), x_v))
    assert out3.shape == (N, hidden_dim)
    assert jnp.allclose(out3, ref.reshape(-1, hidden_dim), atol=1e-5, rtol=1e-5), \
        "2-D path mismatch"

    print("KERNEL_OK")
</pallas_src>

<mosaic_0001>
module attributes {stable_mosaic.version = 11 : i64} {
  func.func @_gru_fused_kernel(%arg0: i32, %arg1: memref<8x24xf32, #tpu.memory_space<vmem>>, %arg2: memref<8x8xf32, #tpu.memory_space<vmem>>, %arg3: memref<8x32xf32, #tpu.memory_space<vmem>>, %arg4: memref<24x128xf32, #tpu.memory_space<vmem>>, %arg5: memref<8x128xf32, #tpu.memory_space<vmem>>, %arg6: memref<32x128xf32, #tpu.memory_space<vmem>>, %arg7: memref<1x128xf32, #tpu.memory_space<vmem>>, %arg8: memref<8x32xf32, #tpu.memory_space<vmem>>) attributes {dimension_semantics = [#tpu.dimension_semantics<parallel>], iteration_bounds = array<i64: 1>, scalar_prefetch = 0 : i64, scratch_operands = 0 : i64, tpu.core_type = #tpu.core_type<tc>, window_params = [{transform_indices = @transform_0, window_bounds = array<i64: 8, 24>}, {transform_indices = @transform_1, window_bounds = array<i64: 8, 8>}, {transform_indices = @transform_2, window_bounds = array<i64: 8, 32>}, {pipeline_mode = #tpu.pipeline_mode<synchronous>, transform_indices = @transform_3, window_bounds = array<i64: 24, 128>}, {pipeline_mode = #tpu.pipeline_mode<synchronous>, transform_indices = @transform_4, window_bounds = array<i64: 8, 128>}, {pipeline_mode = #tpu.pipeline_mode<synchronous>, transform_indices = @transform_5, window_bounds = array<i64: 32, 128>}, {pipeline_mode = #tpu.pipeline_mode<synchronous>, transform_indices = @transform_6, window_bounds = array<i64: 1, 128>}, {transform_indices = @transform_7, window_bounds = array<i64: 8, 32>}]} {
    %c0 = arith.constant 0 : index
    %c0_0 = arith.constant 0 : index
    %0 = vector.load %arg3[%c0, %c0_0] : memref<8x32xf32, #tpu.memory_space<vmem>>, vector<8x32xf32>
    %c0_1 = arith.constant 0 : index
    %c0_2 = arith.constant 0 : index
    %1 = vector.load %arg6[%c0_1, %c0_2] : memref<32x128xf32, #tpu.memory_space<vmem>>, vector<32x128xf32>
    %cst = arith.constant dense<0.000000e+00> : vector<8x128xf32>
    %2 = tpu.matmul %0, %1, %cst {dimension_numbers = #tpu.dot_dimension_numbers<[1], [0], [0], [1], [0, 0, 1, 1], [], []>} : vector<8x32xf32>, vector<32x128xf32>, vector<8x128xf32> -> vector<8x128xf32>
    %c0_3 = arith.constant 0 : index
    %c0_4 = arith.constant 0 : index
    %3 = vector.load %arg1[%c0_3, %c0_4] : memref<8x24xf32, #tpu.memory_space<vmem>>, vector<8x24xf32>
    %c0_5 = arith.constant 0 : index
    %c0_6 = arith.constant 0 : index
    %4 = vector.load %arg4[%c0_5, %c0_6] : memref<24x128xf32, #tpu.memory_space<vmem>>, vector<24x128xf32>
    %cst_7 = arith.constant dense<0.000000e+00> : vector<8x128xf32>
    %5 = tpu.matmul %3, %4, %cst_7 {dimension_numbers = #tpu.dot_dimension_numbers<[1], [0], [0], [1], [0, 0, 1, 1], [], []>} : vector<8x24xf32>, vector<24x128xf32>, vector<8x128xf32> -> vector<8x128xf32>
    %6 = arith.addf %2, %5 : vector<8x128xf32>
    %c0_8 = arith.constant 0 : index
    %c0_9 = arith.constant 0 : index
    %7 = vector.load %arg2[%c0_8, %c0_9] : memref<8x8xf32, #tpu.memory_space<vmem>>, vector<8x8xf32>
    %c0_10 = arith.constant 0 : index
    %c0_11 = arith.constant 0 : index
    %8 = vector.load %arg5[%c0_10, %c0_11] : memref<8x128xf32, #tpu.memory_space<vmem>>, vector<8x128xf32>
    %cst_12 = arith.constant dense<0.000000e+00> : vector<8x128xf32>
    %9 = tpu.matmul %7, %8, %cst_12 {dimension_numbers = #tpu.dot_dimension_numbers<[1], [0], [0], [1], [0, 0, 1, 1], [], []>} : vector<8x8xf32>, vector<8x128xf32>, vector<8x128xf32> -> vector<8x128xf32>
    %10 = arith.addf %6, %9 : vector<8x128xf32>
    %c0_13 = arith.constant 0 : index
    %c0_14 = arith.constant 0 : index
    %11 = vector.load %arg7[%c0_13, %c0_14] : memref<1x128xf32, #tpu.memory_space<vmem>>, vector<1x128xf32>
    %12 = vector.broadcast %11 : vector<1x128xf32> to vector<8x128xf32>
    %13 = arith.addf %10, %12 : vector<8x128xf32>
    %14 = vector.extract_strided_slice %13 {offsets = [0, 0], sizes = [8, 64], strides = [1, 1]} : vector<8x128xf32> to vector<8x64xf32>
    %15 = arith.negf %14 : vector<8x64xf32>
    %16 = math.exp %15 : vector<8x64xf32>
    %cst_15 = arith.constant 1.000000e+00 : f32
    %17 = vector.broadcast %cst_15 : f32 to vector<8x64xf32>
    %18 = arith.addf %17, %16 : vector<8x64xf32>
    %19 = arith.divf %17, %18 : vector<8x64xf32>
    %20 = vector.extract_strided_slice %19 {offsets = [0, 0], sizes = [8, 32], strides = [1, 1]} : vector<8x64xf32> to vector<8x32xf32>
    %21 = vector.extract_strided_slice %19 {offsets = [0, 32], sizes = [8, 32], strides = [1, 1]} : vector<8x64xf32> to vector<8x32xf32>
    %22 = vector.extract_strided_slice %13 {offsets = [0, 64], sizes = [8, 32], strides = [1, 1]} : vector<8x128xf32> to vector<8x32xf32>
    %23 = vector.extract_strided_slice %13 {offsets = [0, 96], sizes = [8, 32], strides = [1, 1]} : vector<8x128xf32> to vector<8x32xf32>
    %24 = arith.mulf %20, %23 : vector<8x32xf32>
    %25 = arith.addf %22, %24 : vector<8x32xf32>
    %26 = math.tanh %25 : vector<8x32xf32>
    %cst_16 = arith.constant 1.000000e+00 : f32
    %27 = vector.broadcast %cst_16 : f32 to vector<8x32xf32>
    %28 = arith.subf %27, %21 : vector<8x32xf32>
    %29 = arith.mulf %28, %26 : vector<8x32xf32>
    %30 = arith.mulf %21, %0 : vector<8x32xf32>
    %31 = arith.addf %29, %30 : vector<8x32xf32>
    %c0_17 = arith.constant 0 : index
    %c0_18 = arith.constant 0 : index
    %32 = vector.load %arg8[%c0_17, %c0_18] : memref<8x32xf32, #tpu.memory_space<vmem>>, vector<8x32xf32>
    tpu.vector_store %arg8[%c0_17, %c0_18], %31 {strides = array<i32>} : memref<8x32xf32, #tpu.memory_space<vmem>>, vector<8x32xf32>,
    return
  }
  func.func @transform_0(%arg0: i32) -> (i32, i32) {
    %c0_i32 = arith.constant 0 : i32
    %c0_i32_0 = arith.constant 0 : i32
    return %arg0, %c0_i32 : i32, i32
  }
  func.func @transform_1(%arg0: i32) -> (i32, i32) {
    %c0_i32 = arith.constant 0 : i32
    %c0_i32_0 = arith.constant 0 : i32
    return %arg0, %c0_i32 : i32, i32
  }
  func.func @transform_2(%arg0: i32) -> (i32, i32) {
    %c0_i32 = arith.constant 0 : i32
    %c0_i32_0 = arith.constant 0 : i32
    return %arg0, %c0_i32 : i32, i32
  }
  func.func @transform_3(%arg0: i32) -> (i32, i32) {
    %c0_i32 = arith.constant 0 : i32
    %c0_i32_0 = arith.constant 0 : i32
    %c0_i32_1 = arith.constant 0 : i32
    return %c0_i32, %c0_i32_0 : i32, i32
  }
  func.func @transform_4(%arg0: i32) -> (i32, i32) {
    %c0_i32 = arith.constant 0 : i32
    %c0_i32_0 = arith.constant 0 : i32
    %c0_i32_1 = arith.constant 0 : i32
    return %c0_i32, %c0_i32_0 : i32, i32
  }
  func.func @transform_5(%arg0: i32) -> (i32, i32) {
    %c0_i32 = arith.constant 0 : i32
    %c0_i32_0 = arith.constant 0 : i32
    %c0_i32_1 = arith.constant 0 : i32
    return %c0_i32, %c0_i32_0 : i32, i32
  }
  func.func @transform_6(%arg0: i32) -> (i32, i32) {
    %c0_i32 = arith.constant 0 : i32
    %c0_i32_0 = arith.constant 0 : i32
    %c0_i32_1 = arith.constant 0 : i32
    return %c0_i32, %c0_i32_0 : i32, i32
  }
  func.func @transform_7(%arg0: i32) -> (i32, i32) {
    %c0_i32 = arith.constant 0 : i32
    %c0_i32_0 = arith.constant 0 : i32
    return %arg0, %c0_i32 : i32, i32
  }
}

</mosaic_0001>

<bundles_post_ra>
// kernel: tpu_custom_call.1
= control target key start
LH: loop header
LB: loop body
LE: loop exit
PB: predicated region body
PF: predicated region fallthrough
CT: control target
= control target key end

     0   :  { %12 = vsyncpa [#allocation3], 0  ;;  %s694_s0 = inlined_call_operand.hbm [shape: f32[8,24], index: 0, kind: input, shape index: {}]   ;;  %s695_s1 = inlined_call_operand.hbm [shape: f32[8,8], index: 1, kind: input, shape index: {}]   ;;  %s696_s2 = inlined_call_operand.hbm [shape: f32[8,32], index: 2, kind: input, shape index: {}]   ;;  %s697_s3 = inlined_call_operand.hbm [shape: f32[24,128], index: 3, kind: input, shape index: {}]   ;;  %s698_s4 = inlined_call_operand.hbm [shape: f32[8,128], index: 4, kind: input, shape index: {}]   ;;  %s699_s5 = inlined_call_operand.hbm [shape: f32[32,128], index: 5, kind: input, shape index: {}]   ;;  %s700_s6 = inlined_call_operand.vmem [shape: f32[1,128], index: 6, kind: input, shape index: {}]   ;;  %s701_s7 = inlined_call_operand.hbm [shape: f32[8,32], index: 7, kind: output, shape index: {}]  }
   0x1   :  { %13 = vsyncpa [#allocation6], 0 }
   0x2   :  { %14 = vsyncpa [#allocation9], 0 }
   0x3   :  { %15 = vsyncpa [#allocation12], 0 }
   0x4   :  { %16 = vsyncpa [#allocation4], 0  ;;  %s605_s24 = smov [#allocation5]   ;;  %s606_s26 = smov [#allocation8]  }
   0x5   :  { %s33_s25 = sshll.u32 %s605_s24, 4  ;;  %s52_s27 = sshll.u32 %s606_s26, 4  ;;  %s34_s25 = int_to_ptr.vmem [resolvable:$true] %s33_s25  ;;  %s53_s27 = int_to_ptr.vmem [resolvable:$true] %s52_s27 }
   0x6   :  { %s463_s28 = scalar_lea.vmem %s34_s25, 128  ;;  %p468_p1 = scmp.lt.s32.totalorder %s34_s25, %s34_s25 }
   0x7   :  { %p464_p0 = scmp.ne.s32.totalorder %s34_s25, %s463_s28  ;;  %p469_p2 = scmp.lt.s32.totalorder %s463_s28, %s463_s28 }
   0x9   :  { %p470_p3 = por %p469_p2, %p468_p1 }
   0xb   :  { %p471_p4 = pnand %p470_p3, %p464_p0 }
   0xd   :  { %474 = shalt.err (!%p471_p4)
}
   0xe   :  { %36 = dma.hbm_to_vmem [thread:$0]  %s695_s1, 128, %s34_s25, [#allocation6]  }
   0xf   :  { %s483_s8 = scalar_lea.vmem %s53_s27, 384  ;;  %p488_p6 = scmp.lt.s32.totalorder %s53_s27, %s53_s27 }
  0x10   :  { %p484_p5 = scmp.ne.s32.totalorder %s53_s27, %s483_s8  ;;  %p489_p7 = scmp.lt.s32.totalorder %s483_s8, %s483_s8 }
  0x12   :  { %p490_p8 = por %p489_p7, %p488_p6 }
  0x14   :  { %p491_p9 = pnand %p490_p8, %p484_p5 }
  0x16   :  { %494 = shalt.err (!%p491_p9)
}
  0x17   :  { %s607_s9 = smov 128   ;;  %s608_s10 = smov 8  }
  0x18   :  { %58 = dma.hbm_to_vmem [thread:$0]  %s697_s3, 384, %s53_s27, [#allocation9], %s607_s9, %s607_s9, %s608_s10  }
  0x19   :  { %s609_s13 = smov [#allocation2]   ;;  %s610_s15 = smov [#allocation7]  }
  0x1a   :  { %s23_s14 = sshll.u32 %s609_s13, 4  ;;  %s43_s1 = sshll.u32 %s610_s15, 4  ;;  %s24_s14 = int_to_ptr.vmem [resolvable:$true] %s23_s14  ;;  %s44_s1 = int_to_ptr.vmem [resolvable:$true] %s43_s1 }
  0x1b   :  { %s503_s16 = scalar_lea.vmem %s24_s14, 128  ;;  %p508_p11 = scmp.lt.s32.totalorder %s24_s14, %s24_s14 }
  0x1c   :  { %p504_p10 = scmp.ne.s32.totalorder %s24_s14, %s503_s16  ;;  %p509_p12 = scmp.lt.s32.totalorder %s503_s16, %s503_s16 }
  0x1e   :  { %p510_p13 = por %p509_p12, %p508_p11 }
  0x20   :  { %p511_p0 = pnand %p510_p13, %p504_p10 }
  0x22   :  { %514 = shalt.err (!%p511_p0)
}
  0x23   :  { %26 = dma.hbm_to_vmem [thread:$0]  %s694_s0, 128, %s24_s14, [#allocation3]  }
  0x24   :  { %s523_s19 = scalar_lea.vmem %s44_s1, 128  ;;  %p528_p2 = scmp.lt.s32.totalorder %s44_s1, %s44_s1 }
  0x25   :  { %p524_p1 = scmp.ne.s32.totalorder %s44_s1, %s523_s19  ;;  %p529_p3 = scmp.lt.s32.totalorder %s523_s19, %s523_s19 }
  0x27   :  { %p530_p4 = por %p529_p3, %p528_p2 }
  0x29   :  { %p531_p5 = pnand %p530_p4, %p524_p1 }
  0x2b   :  { %534 = shalt.err (!%p531_p5)
}
  0x2c   :  { %46 = dma.hbm_to_vmem [thread:$0]  %s696_s2, 128, %s44_s1, [#allocation6]  }
  0x2d   :  { %s611_s21 = smov [#allocation10]   ;;  %s612_s23 = smov [#allocation11]  }
  0x2e   :  { %s65_s22 = sshll.u32 %s611_s21, 4  ;;  %s74_s24 = sshll.u32 %s612_s23, 4  ;;  %s66_s22 = int_to_ptr.vmem [resolvable:$true] %s65_s22  ;;  %s75_s24 = int_to_ptr.vmem [resolvable:$true] %s74_s24 }
  0x2f   :  { %s543_s25 = scalar_lea.vmem %s66_s22, 128  ;;  %p548_p7 = scmp.lt.s32.totalorder %s66_s22, %s66_s22 }
  0x30   :  { %p544_p6 = scmp.ne.s32.totalorder %s66_s22, %s543_s25  ;;  %p549_p8 = scmp.lt.s32.totalorder %s543_s25, %s543_s25 }
  0x32   :  { %p550_p9 = por %p549_p8, %p548_p7 }
  0x34   :  { %p551_p10 = pnand %p550_p9, %p544_p6 }
  0x36   :  { %554 = shalt.err (!%p551_p10)
}
  0x37   :  { %68 = dma.hbm_to_vmem [thread:$0]  %s698_s4, 128, %s66_s22, [#allocation9]  }
  0x38   :  { %s563_s27 = scalar_lea.vmem %s75_s24, 512  ;;  %p568_p12 = scmp.lt.s32.totalorder %s75_s24, %s75_s24 }
  0x39   :  { %p564_p11 = scmp.ne.s32.totalorder %s75_s24, %s563_s27  ;;  %p569_p13 = scmp.lt.s32.totalorder %s563_s27, %s563_s27 }
  0x3b   :  { %p570_p0 = por %p569_p13, %p568_p12 }
  0x3d   :  { %p571_p1 = pnand %p570_p0, %p564_p11 }
  0x3f   :  { %574 = shalt.err (!%p571_p1)
}
  0x40   :  { %80 = dma.hbm_to_vmem [thread:$0]  %s699_s5, 512, %s75_s24, [#allocation12], %s607_s9, %s607_s9, %s608_s10  }
  0x41   :  { %595 = dma.done.wait [#allocation3], 128  }
  0x42   :  { %596 = vsyncadd [#allocation3], 4294967168 }
  0x43   :  { %597 = dma.done.wait [#allocation6], 256  }
  0x44   :  { %598 = vsyncadd [#allocation6], 4294967040 }
  0x45   :  { %599 = dma.done.wait [#allocation9], 512  }
  0x46   :  { %600 = vsyncadd [#allocation9], 4294966784 }
  0x47   :  { %601 = dma.done.wait [#allocation12], 512  }
  0x48   :  { %602 = vsyncadd [#allocation12], 4294966784  ;;  %v613_v0 = vmov 0.0   ;;  %vm614_vm0 = vmmov 0   ;;  %v109_v1 = vld [vmem:[#allocation8 + $0x10] sm:$0xff]  ;;  %v105_v2 = vld [vmem:[#allocation11 + $0x18] sm:$0xff] }
  0x49   :  { %410 = vmatprep.subr.mxu0 %v613_v0  ;;  %419 = vmatprep.subr.mxu1 %v613_v0  ;;  %v108_v3 = vld [vmem:[#allocation8 + $0x8] sm:$0xff]  ;;  %v104_v4 = vld [vmem:[#allocation11 + $0x10] sm:$0xff]  ;;  %v107_v5 = vld [vmem:[#allocation8] sm:$0xff]  ;;  %vm110_vm1 = vcmask 195584   ;;  %vm184_vm2 = vcmask 261120   ;;  %vm260_vm3 = vcmask 64512  }
  0x4a   :  { %416 = vmatprep.mubr.msk.f32.mxu0 %vm614_vm0, %v613_v0  ;;  %427 = vmatprep.mubr.msk.f32.mxu1 %vm614_vm0, %v613_v0  ;;  %v103_v6 = vld [vmem:[#allocation11 + $0x8] sm:$0xff]  ;;  %v102_v8 = vld [vmem:[#allocation11] sm:$0xff]  ;;  %v259_v9 = vld [vmem:[#allocation10] sm:$0xff]  ;;  %s615_s29 = smov 32   ;;  %s616_s30 = smov 64  }
  0x4b   :  { %411 = vmatpush3.msra.mxu0 %v109_v1  ;;  %420 = vmatpush3.msra.mxu1 %v105_v2  ;;  %v106_v7 = vld [vmem:[#allocation2] sm:$0xff]  ;;  %v101_v10 = vld [vmem:[#allocation7] sm:$0xff]  ;;  %v258_v11 = vld [vmem:[#allocation5] sm:$0xff]  ;;  %s618_s8 = smov [#allocation13]  }
  0x4c   :  { %412 = vmatprep.subr.mxu0 %v613_v0  ;;  %421 = vmatprep.subr.mxu1 %v613_v0  ;;  %v397_v18 = vld [vmem:[%s700_s6] ss:$0 sm:$0xff]  ;;  %s617_s6 = smov 96   ;;  %s382_s9 = sshll.u32 %s618_s8, 4  ;;  %s383_s9 = int_to_ptr.vmem [resolvable:$true] %s382_s9 }
  0x4d   :  { %413 = vmatpush3.msra.mxu0 %v108_v3  ;;  %422 = vmatpush3.msra.mxu1 %v104_v4  ;;  %s575_s10 = scalar_lea.vmem %s383_s9, 128  ;;  %p580_p3 = scmp.lt.s32.totalorder %s383_s9, %s383_s9 }
  0x4e   :  { %414 = vmatprep.subr.mxu0 %v613_v0  ;;  %423 = vmatprep.subr.mxu1 %v613_v0  ;;  %p576_p2 = scmp.ne.s32.totalorder %s383_s9, %s575_s10  ;;  %p581_p4 = scmp.lt.s32.totalorder %s575_s10, %s575_s10 }
  0x4f   :  { %415 = vmatpush3.msra.mxu0 %v107_v5  ;;  %424 = vmatpush3.msra.mxu1 %v103_v6 }
  0x50   :  { %417 = vmatmul.mubr.msk.f32.vlgmr.msra.gmra.mxu0 %vm110_vm1, %v106_v7  ;;  %425 = vmatprep.subr.mxu1 %v613_v0  ;;  %p582_p5 = por %p581_p4, %p580_p3 }
  0x51   :  { %430 = vmatprep.subr.mxu0 %v613_v0  ;;  %426 = vmatpush3.msra.mxu1 %v102_v8 }
  0x52   :  { %431 = vmatpush3.msra.mxu0 %v259_v9  ;;  %428 = vmatmul.mubr.msk.f32.vlgmr.msra.gmra.mxu1 %vm184_vm2, %v101_v10  ;;  %p583_p6 = pnand %p582_p5, %p576_p2 }
  0x53   :  { %432 = vmatprep.mubr.msk.f32.mxu0 %vm614_vm0, %v613_v0 }
  0x54   :  { %433 = vmatmul.mubr.msk.f32.vlgmr.msra.gmra.mxu0 %vm260_vm3, %v258_v11 }
 0x110   :  { %v180_v12 = vpop.f32.mrf.mxu0 }
 0x112   :  { %v418_v13 = vpop.f32.mrf.mxu0  ;;  %v254_v14 = vpop.f32.mrf.mxu1 }
 0x113   :  { %v255_v15 = vadd.f32 %v254_v14, %v180_v12 }
 0x114   :  { %v429_v16 = vpop.f32.mrf.mxu1  ;;  %v330_v17 = vpop.f32.mrf.mxu0 }
 0x115   :  { %v334_v19 = vadd.f32 %v330_v17, %v255_v15 }
 0x116   :  { %v434_v20 = vpop.f32.mrf.mxu0 }
 0x117   :  { %v342_v21 = vadd.f32 %v397_v18, %v334_v19 }
 0x119   :  { %350 = vrot.lane.b32.xlu0 %v342_v21, %s615_s29  ;;  %v398_v22 = vmul.f32 -1.442695, %v342_v21 }
 0x11b   :  { %449 = vpow2.f32 %v398_v22 }
 0x128   :  { %v450_v23 = vpop.eup %449 }
 0x129   :  { %v346_v24 = vadd.f32 1.0, %v450_v23 }
 0x12b   :  { %451 = vrcp.f32 %v346_v24 }
 0x138   :  { %v452_v25 = vpop.eup %451 }
 0x139   :  { %v360_v32 = vsub.f32 1.0, %v452_v25 }
 0x18b   :  { %v351_v26 = vpop.permute.xlu0 %350 }
 0x18c   :  { %v353_v27 = vmul.f32 %v452_v25, %v351_v26 }
 0x18e   :  { %355 = vrot.lane.b32.xlu0 %v353_v27, %s616_s30 }
 0x200   :  { %v356_v28 = vpop.permute.xlu0 %355 }
 0x201   :  { %v358_v29 = vadd.f32 %v356_v28, %v342_v21 }
 0x203   :  { %453 = vtanh.f32 %v358_v29 }
 0x210   :  { %v454_v30 = vpop.eup %453 }
 0x211   :  { %362 = vrot.lane.b32.xlu1 %v454_v30, %s617_s6 }
 0x215   :  { %366 = vrot.lane.b32.xlu1 %v101_v10, %s615_s29 }
 0x283   :  { %v363_v31 = vpop.permute.xlu1 %362 }
 0x284   :  { %v365_v34 = vmul.f32 %v363_v31, %v360_v32 }
 0x287   :  { %v367_v33 = vpop.permute.xlu1 %366 }
 0x288   :  { %v369_v35 = vmul.f32 %v452_v25, %v367_v33 }
 0x28a   :  { %v370_v36 = vadd.f32 %v369_v35, %v365_v34 }
 0x28c   :  { %372 = vrot.lane.b32.xlu0 %v370_v36, %s617_s6 }
 0x2fe   :  { %v373_v37 = vpop.permute.xlu0 %372 }
 0x2ff   :  { %375 = vst.msk [vmem:[#allocation13] sm:$0xff] %vm184_vm2, %v373_v37 }
 0x300   :  { %586 = shalt.err (!%p583_p6)
}
 0x301   :  { %385 = dma.vmem_to_hbm [thread:$0]  %s383_s9, 128, %s701_s7, [#allocation4]  }
 0x302   :  { %603 = dma.done.wait [#allocation4], 128  }
 0x303   :  { %604 = vsyncadd [#allocation4], 4294967168 }
 0x304   :  { %389 = vsyncpa [#allocation3], 1 }
 0x305   :  { %390 = vsyncpa [#allocation6], 1 }
 0x306   :  { %391 = vsyncpa [#allocation9], 1 }
 0x307   :  { %392 = vsyncpa [#allocation12], 1 }
 0x308   :  { %393 = vsyncpa [#allocation4], 1 }

</bundles_post_ra>
